<compile_context>
chip_gen: v7x
topology: tpu7x:2x2x1
jax: 0.10.0
libtpu: 0.0.40
codegen_flags: <defaults>
</compile_context>

<pallas_src>
import jax
import jax.numpy as jnp
from jax.experimental import pallas as pl
from jax.experimental.pallas import tpu as pltpu


def _round_up(x, m):
    return ((x + m - 1) // m) * m


def _largest_divisor_multiple_of_128(total, cap):
    """Largest multiple of 128 that divides `total` (total % 128 == 0) and is <= cap."""
    cap = max(128, min(cap, total))
    cap = (cap // 128) * 128
    for cand in range(cap, 0, -128):
        if total % cand == 0:
            return cand
    return 128


def _vmem_capacity_bytes():
    try:
        return int(pltpu.get_tpu_info().vmem_capacity_bytes)
    except Exception:
        return 64 << 20  # conservative default (v7x per-TC VMEM)


def _flatten_head_kernel(x_ref, w_ref, b_ref, o_ref, acc_ref):
    # x_ref: [tm, tk] bf16   w_ref: [tk, tn] bf16   b_ref: [1, tn] f32
    # o_ref: [tm, tn] f32    acc_ref: [tm, tn] f32 scratch
    k = pl.program_id(2)

    @pl.when(k == 0)
    def _():
        acc_ref[...] = jnp.zeros_like(acc_ref)

    acc_ref[...] += jnp.dot(x_ref[...], w_ref[...],
                            preferred_element_type=jnp.float32)

    @pl.when(k == pl.num_programs(2) - 1)
    def _():
        o_ref[...] = (acc_ref[...] + b_ref[...]).astype(o_ref.dtype)


def prepare_flatten_head_params(weight, bias):
    """One-time parameter prep (hoisted out of the per-call hot path).

    weight: [target_window, nf] (nn.Linear convention), bias: [target_window].
    Returns (w_prepped [nf_pad, t_pad] bf16, b_prepped [1, t_pad] f32, T, nf).
    """
    T, nf = weight.shape
    t_pad = _round_up(T, 128)
    nf_pad = _round_up(nf, 128)
    w = jnp.pad(weight, ((0, t_pad - T), (0, nf_pad - nf)))
    w = jnp.transpose(w).astype(jnp.bfloat16)              # [nf_pad, t_pad]
    b = jnp.pad(bias, (0, t_pad - T)).reshape(1, t_pad).astype(jnp.float32)
    return w, b, T, nf


def flatten_head_forward(x, w_prepped, b_prepped, target_window, *, tm_max=512):
    """FlattenHead forward.

    x:         [B, n_vars, d_model, patch_num]
    w_prepped: [nf_pad, t_pad]  bf16  (from prepare_flatten_head_params)
    b_prepped: [1, t_pad]       f32
    Returns:   [B, n_vars, target_window]  f32
    """
    B, n_vars, d_model, patch_num = x.shape
    nf = d_model * patch_num
    nf_pad, t_pad = w_prepped.shape
    assert b_prepped.shape == (1, t_pad)
    assert nf_pad >= nf and nf_pad % 128 == 0 and t_pad % 128 == 0
    T = target_window

    M = B * n_vars
    # flatten(start_dim=-2): row-major reshape matches PyTorch exactly.
    x2d = x.reshape(M, nf)
    if nf_pad != nf:                      # lane-dense K feed
        x2d = jnp.pad(x2d, ((0, 0), (0, nf_pad - nf)))
    x2d = x2d.astype(jnp.bfloat16)        # halves the dominant HBM stream

    # ---- Tile selection, per-chip VMEM budget ----
    vmem_cap = _vmem_capacity_bytes()
    budget = int(vmem_cap * 0.70)         # ~45 MiB v7x, ~90 MiB v5e/v6e
    vmem_limit = int(vmem_cap * 0.85)

    # N tile: multiple of 128 dividing t_pad, <= 512.
    tn = _largest_divisor_multiple_of_128(t_pad, 512)
    # K tile: double-buffered bf16 weight tile gets ~1/3 of the budget.
    tk_cap = max(128, (budget // 3) // (2 * tn * 2))
    tk = _largest_divisor_multiple_of_128(nf_pad, min(tk_cap, 4096))

    # Row tile from remaining budget: 2x bf16 x tile + 2x f32 out tile + f32 acc.
    w_bytes = 2 * tk * tn * 2 + 2 * t_pad * 4
    per_row = 2 * tk * 2 + 2 * tn * 4 + tn * 4
    avail = max(budget - w_bytes, per_row * 8)
    tm = int((avail // per_row) // 8 * 8)
    tm = max(8, min(tm, tm_max))
    tm = min(tm, _round_up(M, 8))
    # Keep >=2 M grid steps when rows allow it: lets ("parallel", ...) split the
    # row axis across v7x's two TensorCores (negligible cost on v5e/v6e).
    if M >= 256:
        tm = min(tm, _round_up((M + 1) // 2, 8))

    m_pad = _round_up(M, tm)
    if m_pad != M:
        x2d = jnp.pad(x2d, ((0, m_pad - M), (0, 0)))

    grid = (m_pad // tm, t_pad // tn, nf_pad // tk)

    cost = pl.CostEstimate(
        flops=2 * m_pad * nf_pad * t_pad,
        transcendentals=0,
        bytes_accessed=(m_pad * nf_pad * 2                    # x (bf16)
                        + grid[0] * nf_pad * t_pad * 2        # weight stream(s), bf16
                        + t_pad * 4                           # bias
                        + m_pad * t_pad * 4),                 # out (f32)
    )

    out = pl.pallas_call(
        _flatten_head_kernel,
        out_shape=jax.ShapeDtypeStruct((m_pad, t_pad), jnp.float32),
        grid=grid,
        in_specs=[
            pl.BlockSpec((tm, tk), lambda i, j, k: (i, k)),   # x row/K tiles
            pl.BlockSpec((tk, tn), lambda i, j, k: (k, j)),   # weight [nf_pad, t_pad]
            pl.BlockSpec((1, tn), lambda i, j, k: (0, j)),    # bias
        ],
        out_specs=pl.BlockSpec((tm, tn), lambda i, j, k: (i, j)),
        scratch_shapes=[pltpu.VMEM((tm, tn), jnp.float32)],
        compiler_params=pltpu.CompilerParams(
            dimension_semantics=("parallel", "parallel", "arbitrary"),
            vmem_limit_bytes=vmem_limit,
        ),
        cost_estimate=cost,
    )(x2d, w_prepped, b_prepped)

    # nn.Dropout(p=0) / eval mode: identity.
    return out[:M, :T].reshape(B, n_vars, T)


def _reference(x, weight, bias):
    B, n_vars, d_model, patch_num = x.shape
    x2d = x.reshape(B, n_vars, d_model * patch_num)
    return jnp.einsum("bvk,tk->bvt", x2d, weight) + bias


if __name__ == "__main__":
    # Small, module-consistent shapes.
    B, n_vars, d_model, patch_num = 2, 4, 16, 8
    nf = d_model * patch_num            # 128
    target_window = 32                  # non-multiple of 128 -> exercises output padding

    key = jax.random.PRNGKey(0)
    kx, kw, kb = jax.random.split(key, 3)

    x = jax.random.normal(kx, (B, n_vars, d_model, patch_num), dtype=jnp.float32)
    # Deterministic synthetic nn.Linear(nf, target_window) parameters.
    bound = 1.0 / jnp.sqrt(nf)
    weight = jax.random.uniform(kw, (target_window, nf), jnp.float32, -bound, bound)
    bias = jax.random.uniform(kb, (target_window,), jnp.float32, -bound, bound)

    # One-time parameter prep (pad / transpose / bf16 cast hoisted off the hot path).
    w_prepped, b_prepped, T, _ = prepare_flatten_head_params(weight, bias)

    y = flatten_head_forward(x, w_prepped, b_prepped, T)
    y = jax.block_until_ready(y)

    y_ref = _reference(x, weight, bias)
    assert y.shape == (B, n_vars, target_window)
    # bf16 inputs + f32 accumulation: deliberately looser tolerance vs the f32 reference.
    assert jnp.allclose(y, y_ref, atol=3e-2, rtol=3e-2), float(jnp.max(jnp.abs(y - y_ref)))

    print("KERNEL_OK")
</pallas_src>

<mosaic_0001>
module attributes {stable_mosaic.version = 11 : i64} {
  func.func @_flatten_head_kernel(%arg0: i32, %arg1: i32, %arg2: i32, %arg3: memref<8x128xbf16, #tpu.memory_space<vmem>>, %arg4: memref<128x128xbf16, #tpu.memory_space<vmem>>, %arg5: memref<1x128xf32, #tpu.memory_space<vmem>>, %arg6: memref<8x128xf32, #tpu.memory_space<vmem>>, %arg7: memref<8x128xf32, #tpu.memory_space<vmem>>) attributes {dimension_semantics = [#tpu.dimension_semantics<parallel>, #tpu.dimension_semantics<parallel>, #tpu.dimension_semantics<arbitrary>], iteration_bounds = array<i64: 1, 1, 1>, scalar_prefetch = 0 : i64, scratch_operands = 1 : i64, tpu.core_type = #tpu.core_type<tc>, window_params = [{transform_indices = @transform_0, window_bounds = array<i64: 8, 128>}, {transform_indices = @transform_1, window_bounds = array<i64: 128, 128>}, {transform_indices = @transform_2, window_bounds = array<i64: 1, 128>}, {transform_indices = @transform_3, window_bounds = array<i64: 8, 128>}]} {
    %c0_i32 = arith.constant 0 : i32
    %0 = arith.cmpi eq, %arg2, %c0_i32 : i32
    %1 = arith.extui %0 : i1 to i32
    %c0_i32_0 = arith.constant 0 : i32
    %2 = arith.cmpi ne, %1, %c0_i32_0 : i32
    scf.if %2 {
      %cst_10 = arith.constant 0.000000e+00 : f32
      %12 = vector.broadcast %cst_10 : f32 to vector<8x128xf32>
      %c0_11 = arith.constant 0 : index
      %c0_12 = arith.constant 0 : index
      %13 = vector.load %arg7[%c0_11, %c0_12] : memref<8x128xf32, #tpu.memory_space<vmem>>, vector<8x128xf32>
      tpu.vector_store %arg7[%c0_11, %c0_12], %12 {strides = array<i32>} : memref<8x128xf32, #tpu.memory_space<vmem>>, vector<8x128xf32>,
    } else {
    }
    %c0 = arith.constant 0 : index
    %c0_1 = arith.constant 0 : index
    %3 = vector.load %arg7[%c0, %c0_1] : memref<8x128xf32, #tpu.memory_space<vmem>>, vector<8x128xf32>
    %c0_2 = arith.constant 0 : index
    %c0_3 = arith.constant 0 : index
    %4 = vector.load %arg3[%c0_2, %c0_3] : memref<8x128xbf16, #tpu.memory_space<vmem>>, vector<8x128xbf16>
    %c0_4 = arith.constant 0 : index
    %c0_5 = arith.constant 0 : index
    %5 = vector.load %arg4[%c0_4, %c0_5] : memref<128x128xbf16, #tpu.memory_space<vmem>>, vector<128x128xbf16>
    %cst = arith.constant dense<0.000000e+00> : vector<8x128xf32>
    %6 = tpu.matmul %4, %5, %cst {dimension_numbers = #tpu.dot_dimension_numbers<[1], [0], [0], [1], [0, 0, 1, 1], [], []>} : vector<8x128xbf16>, vector<128x128xbf16>, vector<8x128xf32> -> vector<8x128xf32>
    %7 = arith.addf %3, %6 : vector<8x128xf32>
    %c0_6 = arith.constant 0 : index
    %c0_7 = arith.constant 0 : index
    %8 = vector.load %arg7[%c0_6, %c0_7] : memref<8x128xf32, #tpu.memory_space<vmem>>, vector<8x128xf32>
    tpu.vector_store %arg7[%c0_6, %c0_7], %7 {strides = array<i32>} : memref<8x128xf32, #tpu.memory_space<vmem>>, vector<8x128xf32>,
    %c0_i32_8 = arith.constant 0 : i32
    %9 = arith.cmpi eq, %arg2, %c0_i32_8 : i32
    %10 = arith.extui %9 : i1 to i32
    %c0_i32_9 = arith.constant 0 : i32
    %11 = arith.cmpi ne, %10, %c0_i32_9 : i32
    scf.if %11 {
      %c0_10 = arith.constant 0 : index
      %c0_11 = arith.constant 0 : index
      %12 = vector.load %arg7[%c0_10, %c0_11] : memref<8x128xf32, #tpu.memory_space<vmem>>, vector<8x128xf32>
      %c0_12 = arith.constant 0 : index
      %c0_13 = arith.constant 0 : index
      %13 = vector.load %arg5[%c0_12, %c0_13] : memref<1x128xf32, #tpu.memory_space<vmem>>, vector<1x128xf32>
      %14 = vector.broadcast %13 : vector<1x128xf32> to vector<8x128xf32>
      %15 = arith.addf %12, %14 : vector<8x128xf32>
      %c0_14 = arith.constant 0 : index
      %c0_15 = arith.constant 0 : index
      %16 = vector.load %arg6[%c0_14, %c0_15] : memref<8x128xf32, #tpu.memory_space<vmem>>, vector<8x128xf32>
      tpu.vector_store %arg6[%c0_14, %c0_15], %15 {strides = array<i32>} : memref<8x128xf32, #tpu.memory_space<vmem>>, vector<8x128xf32>,
    } else {
    }
    return
  }
  func.func @transform_0(%arg0: i32, %arg1: i32, %arg2: i32) -> (i32, i32) {
    %c0_i32 = arith.constant 0 : i32
    return %arg0, %arg2 : i32, i32
  }
  func.func @transform_1(%arg0: i32, %arg1: i32, %arg2: i32) -> (i32, i32) {
    %c0_i32 = arith.constant 0 : i32
    return %arg2, %arg1 : i32, i32
  }
  func.func @transform_2(%arg0: i32, %arg1: i32, %arg2: i32) -> (i32, i32) {
    %c0_i32 = arith.constant 0 : i32
    %c0_i32_0 = arith.constant 0 : i32
    return %c0_i32, %arg1 : i32, i32
  }
  func.func @transform_3(%arg0: i32, %arg1: i32, %arg2: i32) -> (i32, i32) {
    %c0_i32 = arith.constant 0 : i32
    return %arg0, %arg1 : i32, i32
  }
}

</mosaic_0001>

<bundles_post_ra>
// kernel: tpu_custom_call.1
= control target key start
LH: loop header
LB: loop body
LE: loop exit
PB: predicated region body
PF: predicated region fallthrough
CT: control target
= control target key end

     0   :  { %8 = vsyncpa [#allocation4], 0  ;;  %s382_s0 = inlined_call_operand.hbm [shape: bf16[8,128], index: 0, kind: input, shape index: {}]   ;;  %s383_s1 = inlined_call_operand.hbm [shape: bf16[128,128], index: 1, kind: input, shape index: {}]   ;;  %s384_s2 = inlined_call_operand.vmem [shape: f32[1,128], index: 2, kind: input, shape index: {}]   ;;  %s385_s3 = inlined_call_operand.hbm [shape: f32[8,128], index: 3, kind: output, shape index: {}]  }
   0x1   :  { %9 = vsyncpa [#allocation7], 0 }
   0x2   :  { %10 = vsyncpa [#allocation5], 0  ;;  %s309_s12 = smov [#allocation3]   ;;  %s310_s14 = smov [#allocation6]  }
   0x3   :  { %s17_s13 = sshll.u32 %s309_s12, 4  ;;  %s26_s15 = sshll.u32 %s310_s14, 4  ;;  %s18_s13 = int_to_ptr.vmem [resolvable:$true] %s17_s13  ;;  %s336_s15 = int_to_ptr.vmem [resolvable:$true] %s26_s15 }
   0x4   :  { %s237_s18 = scalar_lea.hbm %s382_s0, 64 }
   0x5   :  { %p238_p0 = scmp.ne.s32.totalorder %s382_s0, %s237_s18  ;;  %p241_p1 = scmp.lt.u32.totalorder %s237_s18, %s382_s0 }
   0x7   :  { %p243_p2 = pnand %p241_p1, %p238_p0 }
   0x9   :  { %246 = shalt.err (!%p243_p2)
}
   0xa   :  { %s247_s23 = scalar_lea.vmem %s18_s13, 64  ;;  %p252_p4 = scmp.lt.s32.totalorder %s18_s13, %s18_s13 }
   0xb   :  { %p248_p3 = scmp.ne.s32.totalorder %s18_s13, %s247_s23  ;;  %p253_p5 = scmp.lt.s32.totalorder %s247_s23, %s247_s23 }
   0xd   :  { %p254_p6 = por %p253_p5, %p252_p4 }
   0xf   :  { %p255_p7 = pnand %p254_p6, %p248_p3 }
  0x11   :  { %258 = shalt.err (!%p255_p7)
}
  0x12   :  { %20 = dma.hbm_to_vmem [thread:$0]  %s382_s0, 64, %s18_s13, [#allocation4]  }
  0x13   :  { %s259_s28 = scalar_lea.hbm %s383_s1, 1024 }
  0x14   :  { %p260_p8 = scmp.ne.s32.totalorder %s383_s1, %s259_s28  ;;  %p263_p9 = scmp.lt.u32.totalorder %s259_s28, %s383_s1 }
  0x16   :  { %p265_p10 = pnand %p263_p9, %p260_p8 }
  0x18   :  { %268 = shalt.err (!%p265_p10)
}
  0x19   :  { %s269_s6 = scalar_lea.vmem %s336_s15, 1024  ;;  %p274_p12 = scmp.lt.s32.totalorder %s336_s15, %s336_s15 }
  0x1a   :  { %p270_p11 = scmp.ne.s32.totalorder %s336_s15, %s269_s6  ;;  %p275_p13 = scmp.lt.s32.totalorder %s269_s6, %s269_s6 }
  0x1c   :  { %p276_p0 = por %p275_p13, %p274_p12 }
  0x1e   :  { %p277_p1 = pnand %p276_p0, %p270_p11 }
  0x20   :  { %280 = shalt.err (!%p277_p1)
}
  0x21   :  { %s311_s0 = smov 64   ;;  %s312_s7 = smov 4  }
  0x22   :  { %32 = dma.hbm_to_vmem [thread:$0]  %s383_s1, 1024, %s336_s15, [#allocation7], %s311_s0, %s311_s0, %s312_s7  }
  0x23   :  { %303 = dma.done.wait [#allocation4], 64  }
  0x24   :  { %304 = vsyncadd [#allocation4], 4294967232 }
  0x25   :  { %305 = dma.done.wait [#allocation7], 1024  }
  0x26   :  { %306 = vsyncadd [#allocation7], 4294966272  ;;  %v313_v0 = vmov 0.0   ;;  %vm314_vm0 = vmmov 0   ;;  %v229_v1 = vld [vmem:[#allocation6] sm:$0xff]   ;;  %v230_v2 = vld [vmem:[#allocation6 + $0x8] sm:$0xff]  }
  0x27   :  { %202 = vmatprep.subr.bf16.mxu0 %v313_v0  ;;  %218 = vmatprep.mubr.msk.bf16.mxu0 %vm314_vm0, %v313_v0  ;;  %v231_v3 = vld [vmem:[#allocation6 + $0x10] sm:$0xff]   ;;  %v232_v4 = vld [vmem:[#allocation6 + $0x18] sm:$0xff]   ;;  %v233_v5 = vld [vmem:[#allocation6 + $0x20] sm:$0xff]   ;;  %s315_s11 = smov [#allocation8]  }
  0x28   :  { %203 = vmatpush3.bf16.msra.mxu0 %v229_v1  ;;  %v234_v6 = vld [vmem:[#allocation6 + $0x28] sm:$0xff]   ;;  %v235_v7 = vld [vmem:[#allocation6 + $0x30] sm:$0xff]   ;;  %v236_v8 = vld [vmem:[#allocation6 + $0x38] sm:$0xff]   ;;  %s174_s12 = sshll.u32 %s315_s11, 4  ;;  %s175_s12 = int_to_ptr.vmem [resolvable:$true] %s174_s12 }
  0x29   :  { %204 = vmatprep.subr.bf16.mxu0 %v313_v0  ;;  %v48_v9 = vld [vmem:[#allocation3] sm:$0xf]  ;;  %s281_s13 = scalar_lea.vmem %s175_s12, 128  ;;  %p286_p3 = scmp.lt.s32.totalorder %s175_s12, %s175_s12 }
  0x2a   :  { %v192_v10 = vld [vmem:[%s384_s2] ss:$0 sm:$0xff]  ;;  %p282_p2 = scmp.ne.s32.totalorder %s175_s12, %s281_s13  ;;  %p287_p4 = scmp.lt.s32.totalorder %s281_s13, %s281_s13 }
  0x2c   :  { %205 = vmatpush3.bf16.msra.mxu0 %v230_v2  ;;  %p288_p5 = por %p287_p4, %p286_p3 }
  0x2d   :  { %206 = vmatprep.subr.bf16.mxu0 %v313_v0 }
  0x2e   :  { %p289_p6 = pnand %p288_p5, %p282_p2 }
  0x30   :  { %207 = vmatpush3.bf16.msra.mxu0 %v231_v3 }
  0x31   :  { %208 = vmatprep.subr.bf16.mxu0 %v313_v0 }
  0x34   :  { %209 = vmatpush3.bf16.msra.mxu0 %v232_v4 }
  0x35   :  { %210 = vmatprep.subr.bf16.mxu0 %v313_v0 }
  0x38   :  { %211 = vmatpush3.bf16.msra.mxu0 %v233_v5 }
  0x39   :  { %212 = vmatprep.subr.bf16.mxu0 %v313_v0 }
  0x3c   :  { %213 = vmatpush3.bf16.msra.mxu0 %v234_v6 }
  0x3d   :  { %214 = vmatprep.subr.bf16.mxu0 %v313_v0 }
  0x40   :  { %215 = vmatpush3.bf16.msra.mxu0 %v235_v7 }
  0x41   :  { %216 = vmatprep.subr.bf16.mxu0 %v313_v0 }
  0x44   :  { %217 = vmatpush3.bf16.msra.mxu0 %v236_v8 }
  0x47   :  { %219 = vmatmul.mubr.bf16.vlgmr.msra.gmra.mrb[0].mxu0 %v48_v9 }
 0x11a   :  { %v147_v11 = vpop.f32.mrb[0].mxu0 }
 0x11b   :  { %v166_v12 = vadd.f32 %v192_v10, %v147_v11  ;;  %v220_v13 = vpop.f32.mrb[1].mxu0 }
 0x11c   :  { %v150_v14 = vpop.f32.mrb[2].mxu0 }
 0x11d   :  { %167 = vst [vmem:[#allocation8] sm:$0xff] %v166_v12  ;;  %v221_v15 = vpop.f32.mrb[3].mxu0 }
 0x11e   :  { %292 = shalt.err (!%p289_p6)
}
 0x11f   :  { %s293_s2 = scalar_lea.hbm %s385_s3, 128 }
 0x120   :  { %p294_p7 = scmp.ne.s32.totalorder %s385_s3, %s293_s2  ;;  %p297_p8 = scmp.lt.u32.totalorder %s293_s2, %s385_s3 }
 0x122   :  { %p299_p9 = pnand %p297_p8, %p294_p7 }
 0x124   :  { %302 = shalt.err (!%p299_p9)
}
 0x125   :  { %177 = dma.vmem_to_hbm [thread:$0]  %s175_s12, 128, %s385_s3, [#allocation5]  }
 0x126   :  { %307 = dma.done.wait [#allocation5], 128  }
 0x127   :  { %308 = vsyncadd [#allocation5], 4294967168 }
 0x128   :  { %181 = vsyncpa [#allocation4], 1 }
 0x129   :  { %182 = vsyncpa [#allocation7], 1 }
 0x12a   :  { %183 = vsyncpa [#allocation5], 1 }

</bundles_post_ra>
